<compile_context>
chip_gen: v6e
topology: v6e:2x2x1
jax: 0.10.0
libtpu: 0.0.40
codegen_flags: <defaults>
</compile_context>

<pallas_src>
import functools

import jax
import jax.numpy as jnp
import numpy as np
from jax import lax
from jax.experimental import pallas as pl
from jax.experimental.pallas import tpu as pltpu


# ---------------------------------------------------------------------------
# Kernel
# ---------------------------------------------------------------------------
def _cls_head_kernel(x_ref, w_ref, y_ref, partial_ref, *, B, num_classes,
                     tile_b, tile_n):
    j = pl.program_id(0)  # class-tile index (slow grid axis)
    i = pl.program_id(1)  # batch-tile index (fast grid axis)

    x_v = x_ref[...]
    w_v = w_ref[...]
    if x_v.dtype != w_v.dtype:
        # Narrow weights (e.g. bf16) stream narrow from HBM; promote in-vreg.
        common = jnp.promote_types(x_v.dtype, w_v.dtype)
        x_v = x_v.astype(common)
        w_v = w_v.astype(common)

    # logits block: (tile_b, tile_n) = x(tile_b, C_in) . w_tile(tile_n, C_in)^T
    z = lax.dot_general(
        x_v, w_v,
        dimension_numbers=(((1,), (1,)), ((), ())),
        preferred_element_type=jnp.float32,
    )
    p = jax.nn.sigmoid(z)
    y = y_ref[...].astype(jnp.float32)

    # nn.BCELoss clamps the log terms at -100 (PyTorch semantics).
    log_p = jnp.maximum(jnp.log(p), -100.0)
    log_1mp = jnp.maximum(jnp.log1p(-p), -100.0)
    bce = -(y * log_p + (1.0 - y) * log_1mp)

    # Static masking of padded class columns / batch rows (the selects are
    # only emitted when the tile sizes do not divide the problem).
    if num_classes % tile_n != 0:
        col = j * tile_n + lax.broadcasted_iota(jnp.int32, bce.shape, 1)
        bce = jnp.where(col < num_classes, bce, 0.0)
    if B % tile_b != 0:
        row = i * tile_b + lax.broadcasted_iota(jnp.int32, bce.shape, 0)
        bce = jnp.where(row < B, bce, 0.0)

    # Per-block partial sum, reduced over the batch (sublane) axis only: the
    # store stays lane-dense and every grid step owns its own output block.
    partial = jnp.sum(bce, axis=0, keepdims=True)  # (1, tile_n)
    partial_ref[...] = partial.reshape(partial_ref.shape)


# ---------------------------------------------------------------------------
# Generation-aware configuration
# ---------------------------------------------------------------------------
def _tpu_generation_config():
    """Return (vmem_limit_bytes, num_tensorcores) for the current TPU."""
    vmem_cap = None
    try:
        info = pltpu.get_tpu_info()
        vmem_cap = int(getattr(info, "vmem_capacity_bytes", 0)) or None
    except Exception:
        vmem_cap = None
    kind = ""
    try:
        kind = jax.devices()[0].device_kind.lower()
    except Exception:
        pass
    if vmem_cap is None:
        vmem_cap = (64 << 20) if "v7" in kind else (128 << 20)
    if vmem_cap <= (64 << 20) or "v7" in kind:
        # v7x-like: only 64 MiB VMEM per TC, but two TensorCores per chip.
        return 32 << 20, 2
    # v5e / v6e: 128 MiB physical VMEM, one TensorCore per chip.
    return 64 << 20, 1


def _pick_tiles(B, C_in, num_classes, *, x_itemsize, w_itemsize, y_itemsize,
                out_itemsize, vmem_limit_bytes, num_tensorcores):
    """Pick (tile_b, num_b_tiles, tile_n, num_n_tiles)."""
    # Batch tile: whole batch when small; multiple-of-8 tiles otherwise to
    # bound the (tile_b, tile_n) f32 intermediates' vreg/VMEM pressure.
    if B <= 512:
        tile_b = B
    else:
        tile_b = 256
    num_b_tiles = pl.cdiv(B, tile_b)

    # Class tile: the largest multiple of 128 whose double-buffered streams
    # (W tile + y tile + out tile), plus the double-buffered x tile, fit in
    # ~75% of the scoped VMEM limit.
    budget = int(vmem_limit_bytes * 0.75)
    fixed = 2 * tile_b * C_in * x_itemsize
    per_n = 2 * C_in * w_itemsize + 2 * tile_b * y_itemsize + 2 * out_itemsize
    n_full = pl.cdiv(num_classes, 128) * 128
    avail_n = max(128, ((budget - fixed) // per_n) // 128 * 128)
    tile_n = int(min(n_full, avail_n))

    # v7x: guarantee >= 2 grid tiles so the "parallel" axes can be sharded
    # across both TensorCores (each TC has its own path to HBM).
    if (num_tensorcores >= 2 and num_b_tiles == 1 and num_classes >= 256
            and tile_n >= n_full):
        tile_n = int(max(128, pl.cdiv(pl.cdiv(num_classes, 2), 128) * 128))

    num_n_tiles = pl.cdiv(num_classes, tile_n)
    return tile_b, num_b_tiles, tile_n, num_n_tiles


# ---------------------------------------------------------------------------
# Wrapper == ClsHead.forward(x, y)   (with_avg_pool=False)
# ---------------------------------------------------------------------------
def cls_head_loss(x, w, y, *, tile_b=None, tile_n=None, vmem_limit_bytes=None):
    """BCELoss(sigmoid(x @ w.T), y), mean reduction.

    x: (B, C_in)            -- features (f32 or bf16)
    w: (num_classes, C_in)  -- native nn.Linear weight layout, bias=False;
                               pass it in whatever dtype it is *stored* in
                               (bf16 halves the dominant HBM stream).
    y: (B, num_classes)     -- targets in [0, 1]; narrow dtypes (bf16) accepted.
    """
    B, C_in = x.shape
    num_classes = w.shape[0]
    assert w.shape == (num_classes, C_in)
    assert y.shape == (B, num_classes)

    auto_limit, num_tc = _tpu_generation_config()
    if vmem_limit_bytes is None:
        vmem_limit_bytes = auto_limit

    tb, num_b_tiles, tn, num_n_tiles = _pick_tiles(
        B, C_in, num_classes,
        x_itemsize=x.dtype.itemsize, w_itemsize=w.dtype.itemsize,
        y_itemsize=y.dtype.itemsize, out_itemsize=4,
        vmem_limit_bytes=vmem_limit_bytes, num_tensorcores=num_tc)
    if tile_b is not None:
        tb = int(tile_b)
        num_b_tiles = pl.cdiv(B, tb)
    if tile_n is not None:
        tn = int(tile_n)
        num_n_tiles = pl.cdiv(num_classes, tn)

    kernel = functools.partial(_cls_head_kernel, B=B, num_classes=num_classes,
                               tile_b=tb, tile_n=tn)

    cost = pl.CostEstimate(
        flops=2 * B * C_in * num_classes,
        transcendentals=3 * B * num_classes,  # sigmoid + two logs per element
        bytes_accessed=(
            num_classes * C_in * w.dtype.itemsize          # W: streamed once
            + num_n_tiles * B * C_in * x.dtype.itemsize    # x: once per class tile
            + B * num_classes * y.dtype.itemsize           # y: streamed once
            + num_b_tiles * num_n_tiles * tn * 4            # partial sums out
        ),
    )

    partials = pl.pallas_call(
        kernel,
        out_shape=jax.ShapeDtypeStruct((num_b_tiles, 1, num_n_tiles * tn),
                                       jnp.float32),
        grid_spec=pltpu.PrefetchScalarGridSpec(
            num_scalar_prefetch=0,
            # Class tiles on the slow axis, batch tiles on the fast axis: the
            # W tile's block index is constant across the inner batch steps,
            # so the weight stream is DMA'd from HBM exactly once.
            grid=(num_n_tiles, num_b_tiles),
            in_specs=[
                pl.BlockSpec((tb, C_in), lambda j, i: (i, 0)),   # x tile
                pl.BlockSpec((tn, C_in), lambda j, i: (j, 0)),   # W tile (native layout)
                pl.BlockSpec((tb, tn), lambda j, i: (i, j)),     # y tile
            ],
            out_specs=pl.BlockSpec((1, 1, tn), lambda j, i: (i, 0, j)),
        ),
        compiler_params=pltpu.CompilerParams(
            dimension_semantics=("parallel", "parallel"),
            vmem_limit_bytes=vmem_limit_bytes,
        ),
        cost_estimate=cost,
    )(x, w, y)

    # Tiny final reduction + mean normalization in plain JAX.
    return jnp.sum(partials) / jnp.float32(B * num_classes)


# ---------------------------------------------------------------------------
# Reference + demo
# ---------------------------------------------------------------------------
def _reference_loss(x, w, y):
    z = x.astype(jnp.float32) @ w.astype(jnp.float32).T
    p = jax.nn.sigmoid(z)
    log_p = jnp.maximum(jnp.log(p), -100.0)
    log_1mp = jnp.maximum(jnp.log1p(-p), -100.0)
    return jnp.mean(-(y.astype(jnp.float32) * log_p
                      + (1.0 - y.astype(jnp.float32)) * log_1mp))


if __name__ == "__main__":
    # ClsHead(in_channels=32, num_classes=256, with_avg_pool=False) at small B.
    # TODO(synk): with_avg_pool=True path not implemented (self.avg_pool is
    # never defined in the reference module either).
    B, C_IN, NUM_CLASSES = 8, 32, 256

    key = jax.random.PRNGKey(0)
    kx, kw, ky = jax.random.split(key, 3)

    x = jax.random.normal(kx, (B, C_IN), dtype=jnp.float32)
    bound = 1.0 / np.sqrt(C_IN)  # Kaiming-uniform-like Linear init bound
    w = jax.random.uniform(
        kw, (NUM_CLASSES, C_IN), minval=-bound, maxval=bound, dtype=jnp.float32
    )
    y = jax.random.bernoulli(ky, 0.5, (B, NUM_CLASSES)).astype(jnp.float32)

    # 1) f32 everything, divisible num_classes.
    loss = jax.block_until_ready(cls_head_loss(x, w, y))
    ref = jax.block_until_ready(_reference_loss(x, w, y))
    assert np.isfinite(float(loss))
    np.testing.assert_allclose(float(loss), float(ref), rtol=1e-5, atol=1e-5)

    # 2) Non-divisible num_classes (masked partial class tile) + bf16 targets
    #    (narrow y stream; exact for {0,1} labels).
    N2 = 200
    w2 = jax.random.uniform(
        kw, (N2, C_IN), minval=-bound, maxval=bound, dtype=jnp.float32
    )
    y2 = jax.random.bernoulli(ky, 0.5, (B, N2)).astype(jnp.bfloat16)
    loss2 = jax.block_until_ready(cls_head_loss(x, w2, y2, tile_n=128))
    ref2 = jax.block_until_ready(_reference_loss(x, w2, y2))
    np.testing.assert_allclose(float(loss2), float(ref2), rtol=1e-5, atol=1e-5)

    # 3) bf16-stored weights (narrow weight stream, promoted in-kernel).
    w_bf16 = w.astype(jnp.bfloat16)
    loss3 = jax.block_until_ready(cls_head_loss(x, w_bf16, y))
    ref3 = jax.block_until_ready(_reference_loss(x, w_bf16, y))
    np.testing.assert_allclose(float(loss3), float(ref3), rtol=1e-4, atol=1e-4)

    # 4) Batch tiling with a masked partial batch tile (B=20, tile_b=8).
    B4 = 20
    x4 = jax.random.normal(kx, (B4, C_IN), dtype=jnp.float32)
    y4 = jax.random.bernoulli(ky, 0.5, (B4, NUM_CLASSES)).astype(jnp.float32)
    loss4 = jax.block_until_ready(cls_head_loss(x4, w, y4, tile_b=8))
    ref4 = jax.block_until_ready(_reference_loss(x4, w, y4))
    np.testing.assert_allclose(float(loss4), float(ref4), rtol=1e-5, atol=1e-5)

    print("KERNEL_OK")
</pallas_src>

<mosaic_0001>
module attributes {stable_mosaic.version = 11 : i64} {
  func.func @_cls_head_kernel(%arg0: i32, %arg1: i32, %arg2: memref<8x32xf32, #tpu.memory_space<vmem>>, %arg3: memref<256x32xf32, #tpu.memory_space<vmem>>, %arg4: memref<8x256xf32, #tpu.memory_space<vmem>>, %arg5: memref<1x1x256xf32, #tpu.memory_space<vmem>>) attributes {dimension_semantics = [#tpu.dimension_semantics<parallel>, #tpu.dimension_semantics<parallel>], iteration_bounds = array<i64: 1, 1>, scalar_prefetch = 0 : i64, scratch_operands = 0 : i64, tpu.core_type = #tpu.core_type<tc>, window_params = [{transform_indices = @transform_0, window_bounds = array<i64: 8, 32>}, {transform_indices = @transform_1, window_bounds = array<i64: 256, 32>}, {transform_indices = @transform_2, window_bounds = array<i64: 8, 256>}, {transform_indices = @transform_3, window_bounds = array<i64: 1, 1, 256>}]} {
    %c0 = arith.constant 0 : index
    %c0_0 = arith.constant 0 : index
    %0 = vector.load %arg2[%c0, %c0_0] : memref<8x32xf32, #tpu.memory_space<vmem>>, vector<8x32xf32>
    %c0_1 = arith.constant 0 : index
    %c0_2 = arith.constant 0 : index
    %1 = vector.load %arg3[%c0_1, %c0_2] : memref<256x32xf32, #tpu.memory_space<vmem>>, vector<256x32xf32>
    %cst = arith.constant dense<0.000000e+00> : vector<8x256xf32>
    %2 = tpu.matmul %0, %1, %cst {dimension_numbers = #tpu.dot_dimension_numbers<[1], [1], [0], [0], [0, 0, 1, 0], [], []>} : vector<8x32xf32>, vector<256x32xf32>, vector<8x256xf32> -> vector<8x256xf32>
    %3 = arith.negf %2 : vector<8x256xf32>
    %4 = math.exp %3 : vector<8x256xf32>
    %cst_3 = arith.constant 1.000000e+00 : f32
    %5 = vector.broadcast %cst_3 : f32 to vector<8x256xf32>
    %6 = arith.addf %5, %4 : vector<8x256xf32>
    %7 = arith.divf %5, %6 : vector<8x256xf32>
    %c0_4 = arith.constant 0 : index
    %c0_5 = arith.constant 0 : index
    %8 = vector.load %arg4[%c0_4, %c0_5] : memref<8x256xf32, #tpu.memory_space<vmem>>, vector<8x256xf32>
    %9 = math.log %7 : vector<8x256xf32>
    %cst_6 = arith.constant -1.000000e+02 : f32
    %10 = vector.broadcast %cst_6 : f32 to vector<8x256xf32>
    %11 = arith.maximumf %9, %10 : vector<8x256xf32>
    %cst_7 = arith.constant 0.000000e+00 : f32
    %12 = vector.broadcast %cst_7 : f32 to vector<8x256xf32>
    %13 = arith.subf %12, %7 : vector<8x256xf32>
    %14 = math.log1p %13 : vector<8x256xf32>
    %cst_8 = arith.constant -1.000000e+02 : f32
    %15 = vector.broadcast %cst_8 : f32 to vector<8x256xf32>
    %16 = arith.maximumf %14, %15 : vector<8x256xf32>
    %17 = arith.mulf %8, %11 : vector<8x256xf32>
    %cst_9 = arith.constant 1.000000e+00 : f32
    %18 = vector.broadcast %cst_9 : f32 to vector<8x256xf32>
    %19 = arith.subf %18, %8 : vector<8x256xf32>
    %20 = arith.mulf %19, %16 : vector<8x256xf32>
    %21 = arith.addf %17, %20 : vector<8x256xf32>
    %cst_10 = arith.constant 0.000000e+00 : f32
    %22 = vector.broadcast %cst_10 : f32 to vector<8x256xf32>
    %23 = arith.subf %22, %21 : vector<8x256xf32>
    %cst_11 = arith.constant dense<0.000000e+00> : vector<256xf32>
    %24 = vector.multi_reduction <add>, %23, %cst_11 [0] : vector<8x256xf32> to vector<256xf32>
    %25 = vector.shape_cast %24 : vector<256xf32> to vector<1x256xf32>
    %26 = vector.shape_cast %25 : vector<1x256xf32> to vector<1x1x256xf32>
    %c0_12 = arith.constant 0 : index
    %c0_13 = arith.constant 0 : index
    %c0_14 = arith.constant 0 : index
    %27 = vector.load %arg5[%c0_12, %c0_13, %c0_14] : memref<1x1x256xf32, #tpu.memory_space<vmem>>, vector<1x1x256xf32>
    tpu.vector_store %arg5[%c0_12, %c0_13, %c0_14], %26 {strides = array<i32>} : memref<1x1x256xf32, #tpu.memory_space<vmem>>, vector<1x1x256xf32>,
    return
  }
  func.func @transform_0(%arg0: i32, %arg1: i32) -> (i32, i32) {
    %c0_i32 = arith.constant 0 : i32
    %c0_i32_0 = arith.constant 0 : i32
    return %arg1, %c0_i32 : i32, i32
  }
  func.func @transform_1(%arg0: i32, %arg1: i32) -> (i32, i32) {
    %c0_i32 = arith.constant 0 : i32
    %c0_i32_0 = arith.constant 0 : i32
    return %arg0, %c0_i32 : i32, i32
  }
  func.func @transform_2(%arg0: i32, %arg1: i32) -> (i32, i32) {
    %c0_i32 = arith.constant 0 : i32
    return %arg1, %arg0 : i32, i32
  }
  func.func @transform_3(%arg0: i32, %arg1: i32) -> (i32, i32, i32) {
    %c0_i32 = arith.constant 0 : i32
    %c0_i32_0 = arith.constant 0 : i32
    return %arg1, %c0_i32, %arg0 : i32, i32, i32
  }
}

</mosaic_0001>

<bundles_post_ra>
// kernel: tpu_custom_call.1
= control target key start
LH: loop header
LB: loop body
LE: loop exit
PB: predicated region body
PF: predicated region fallthrough
CT: control target
= control target key end

     0   :  { %vm48_vm0 = vcmask 261120   ;;  %s593_s0 = inlined_call_operand.vmem [shape: f32[8,32], index: 0, kind: input, shape index: {}]   ;;  %s594_s1 = inlined_call_operand.vmem [shape: f32[256,32], index: 1, kind: input, shape index: {}]   ;;  %s595_s2 = inlined_call_operand.vmem [shape: f32[8,256], index: 2, kind: input, shape index: {}]   ;;  %s596_s3 = inlined_call_operand.hbm [shape: f32[1,1,256], index: 3, kind: output, shape index: {}]  }
   0x1   :  { %v47_v0 = vld [vmem:[%s594_s1 + $0xf8] sm:$0xff]  ;;  %v46_v2 = vld [vmem:[%s594_s1 + $0xf0] sm:$0xff]  ;;  %v45_v4 = vld [vmem:[%s594_s1 + $0xe8] sm:$0xff] }
   0x2   :  { %v31_v1 = vld [vmem:[%s594_s1 + $0x78] sm:$0xff]  ;;  %355 = vmatprep.subr.msk.mxu0 %vm48_vm0, %v47_v0  ;;  %v30_v3 = vld [vmem:[%s594_s1 + $0x70] sm:$0xff]  ;;  %v29_v5 = vld [vmem:[%s594_s1 + $0x68] sm:$0xff] }
   0x3   :  { %356 = vmatpush3.xpose.msk.msra.mxu0 %vm48_vm0, %v31_v1  ;;  %v44_v6 = vld [vmem:[%s594_s1 + $0xe0] sm:$0xff] }
   0x4   :  { %357 = vmatprep.subr.msk.mxu0 %vm48_vm0, %v46_v2  ;;  %v15_v7 = vld [vmem:[%s593_s0] sm:$0xff] }
   0x5   :  { %v28_v8 = vld [vmem:[%s594_s1 + $0x60] sm:$0xff]  ;;  %387 = vmatprep.mubr.msk.f32.mxu0 %vm48_vm0, %v15_v7 }
   0x7   :  { %358 = vmatpush3.xpose.msk.msra.mxu0 %vm48_vm0, %v30_v3 }
   0x8   :  { %359 = vmatprep.subr.msk.mxu0 %vm48_vm0, %v45_v4 }
   0xb   :  { %360 = vmatpush3.xpose.msk.msra.mxu0 %vm48_vm0, %v29_v5 }
   0xc   :  { %361 = vmatprep.subr.msk.mxu0 %vm48_vm0, %v44_v6 }
   0xd   :  { %8 = vsyncpa [#allocation3], 0  ;;  %v43_v9 = vld [vmem:[%s594_s1 + $0xd8] sm:$0xff]  ;;  %v42_v11 = vld [vmem:[%s594_s1 + $0xd0] sm:$0xff] }
   0xe   :  { %v27_v10 = vld [vmem:[%s594_s1 + $0x58] sm:$0xff]  ;;  %v26_v12 = vld [vmem:[%s594_s1 + $0x50] sm:$0xff]  ;;  %v41_v13 = vld [vmem:[%s594_s1 + $0xc8] sm:$0xff] }
   0xf   :  { %362 = vmatpush3.xpose.msk.msra.mxu0 %vm48_vm0, %v28_v8  ;;  %v25_v14 = vld [vmem:[%s594_s1 + $0x48] sm:$0xff]  ;;  %v40_v15 = vld [vmem:[%s594_s1 + $0xc0] sm:$0xff]  ;;  %v39_v17 = vld [vmem:[%s594_s1 + $0xb8] sm:$0xff] }
  0x10   :  { %363 = vmatprep.subr.msk.mxu0 %vm48_vm0, %v43_v9  ;;  %v24_v16 = vld [vmem:[%s594_s1 + $0x40] sm:$0xff]  ;;  %v23_v18 = vld [vmem:[%s594_s1 + $0x38] sm:$0xff]  ;;  %v38_v19 = vld [vmem:[%s594_s1 + $0xb0] sm:$0xff] }
  0x11   :  { %v22_v20 = vld [vmem:[%s594_s1 + $0x30] sm:$0xff]  ;;  %v37_v21 = vld [vmem:[%s594_s1 + $0xa8] sm:$0xff]  ;;  %v36_v23 = vld [vmem:[%s594_s1 + $0xa0] sm:$0xff] }
  0x12   :  { %v21_v22 = vld [vmem:[%s594_s1 + $0x28] sm:$0xff]  ;;  %v20_v24 = vld [vmem:[%s594_s1 + $0x20] sm:$0xff]  ;;  %v35_v25 = vld [vmem:[%s594_s1 + $0x98] sm:$0xff] }
  0x13   :  { %364 = vmatpush3.xpose.msk.msra.mxu0 %vm48_vm0, %v27_v10  ;;  %v19_v26 = vld [vmem:[%s594_s1 + $0x18] sm:$0xff]  ;;  %v34_v27 = vld [vmem:[%s594_s1 + $0x90] sm:$0xff]  ;;  %v33_v29 = vld [vmem:[%s594_s1 + $0x88] sm:$0xff] }
  0x14   :  { %365 = vmatprep.subr.msk.mxu0 %vm48_vm0, %v42_v11  ;;  %v18_v28 = vld [vmem:[%s594_s1 + $0x10] sm:$0xff]  ;;  %v17_v30 = vld [vmem:[%s594_s1 + $0x8] sm:$0xff]  ;;  %v32_v31 = vld [vmem:[%s594_s1 + $0x80] sm:$0xff] }
  0x15   :  { %v16_v32 = vld [vmem:[%s594_s1] sm:$0xff]  ;;  %v232_v0 = vld [vmem:[%s595_s2 + $0x8] sm:$0xff] }
  0x16   :  { %v231_v58 = vld [vmem:[%s595_s2] sm:$0xff]  ;;  %v264_v6 = vsub.f32 1.0, %v232_v0  ;;  %s430_s2 = smov [#allocation2]  }
  0x17   :  { %366 = vmatpush3.xpose.msk.msra.mxu0 %vm48_vm0, %v26_v12  ;;  %v263_v63 = vsub.f32 1.0, %v231_v58  ;;  %s312_s25 = sshll.u32 %s430_s2, 4  ;;  %s313_s25 = int_to_ptr.vmem [resolvable:$true] %s312_s25 }
  0x18   :  { %367 = vmatprep.subr.msk.mxu0 %vm48_vm0, %v41_v13  ;;  %s407_s26 = scalar_lea.vmem %s313_s25, 32  ;;  %p412_p1 = scmp.lt.s32.totalorder %s313_s25, %s313_s25 }
  0x19   :  { %p408_p0 = scmp.ne.s32.totalorder %s313_s25, %s407_s26  ;;  %p413_p2 = scmp.lt.s32.totalorder %s407_s26, %s407_s26 }
  0x1b   :  { %368 = vmatpush3.xpose.msk.msra.mxu0 %vm48_vm0, %v25_v14  ;;  %p414_p3 = por %p413_p2, %p412_p1 }
  0x1c   :  { %369 = vmatprep.subr.msk.mxu0 %vm48_vm0, %v40_v15 }
  0x1d   :  { %p415_p4 = pnand %p414_p3, %p408_p0 }
  0x1f   :  { %370 = vmatpush3.xpose.msk.msra.mxu0 %vm48_vm0, %v24_v16 }
  0x20   :  { %371 = vmatprep.subr.msk.mxu0 %vm48_vm0, %v39_v17 }
  0x23   :  { %372 = vmatpush3.xpose.msk.msra.mxu0 %vm48_vm0, %v23_v18 }
  0x24   :  { %373 = vmatprep.subr.msk.mxu0 %vm48_vm0, %v38_v19 }
  0x27   :  { %374 = vmatpush3.xpose.msk.msra.mxu0 %vm48_vm0, %v22_v20 }
  0x28   :  { %375 = vmatprep.subr.msk.mxu0 %vm48_vm0, %v37_v21 }
  0x2b   :  { %376 = vmatpush3.xpose.msk.msra.mxu0 %vm48_vm0, %v21_v22  ;;  %v429_v22 = vmov 1966171168  }
  0x2c   :  { %377 = vmatprep.subr.msk.mxu0 %vm48_vm0, %v36_v23  ;;  %v287_v23 = vunpack.c.l.s4 %v429_v22 }
  0x2f   :  { %378 = vmatpush3.xpose.msk.msra.mxu0 %vm48_vm0, %v20_v24  ;;  %v289_v24 = vlaneseq }
  0x30   :  { %379 = vmatprep.subr.msk.mxu0 %vm48_vm0, %v35_v25 }
  0x31   :  { %vm303_vm3 = vcmp.lt.s32.totalorder %v289_v24, 256 }
  0x33   :  { %380 = vmatpush3.xpose.msk.msra.mxu0 %vm48_vm0, %v19_v26 }
  0x34   :  { %381 = vmatprep.subr.msk.mxu0 %vm48_vm0, %v34_v27 }
  0x37   :  { %382 = vmatpush3.xpose.msk.msra.mxu0 %vm48_vm0, %v18_v28 }
  0x38   :  { %383 = vmatprep.subr.msk.mxu0 %vm48_vm0, %v33_v29  ;;  %v288_v29 = vunpack.c.0.s8 %v287_v23 }
  0x3b   :  { %384 = vmatpush3.xpose.msk.msra.mxu0 %vm48_vm0, %v17_v30  ;;  %v290_v30 = vshrl.u32 %v289_v24, 7 }
  0x3c   :  { %385 = vmatprep.subr.msk.mxu0 %vm48_vm0, %v32_v31 }
  0x3f   :  { %386 = vmatpush3.xpose.msk.msra.mxu0 %vm48_vm0, %v16_v32 }
  0x42   :  { %388 = vmatmul.mubr.msk.f32.vlgmr.msra.gmra.mxu0 %vm48_vm0, %v15_v7 }
 0x102   :  { %v214_v33 = vpop.f32.mrf.mxu0 }
 0x103   :  { %v353_v34 = vmul.f32 -1.442695, %v214_v33 }
 0x104   :  { %v216_v35 = vpop.f32.mrf.mxu0 }
 0x105   :  { %391 = vpow2.f32 %v353_v34  ;;  %v354_v36 = vmul.f32 -1.442695, %v216_v35  ;;  %v291_v34 = vsub.s32 %v288_v29, %v290_v30 }
 0x107   :  { %393 = vpow2.f32 %v354_v36 }
 0x112   :  { %v392_v37 = vpop.eup %391 }
 0x113   :  { %v225_v38 = vadd.f32 1.0, %v392_v37 }
 0x114   :  { %v394_v39 = vpop.eup %393 }
 0x115   :  { %395 = vrcp.f32 %v225_v38  ;;  %v226_v40 = vadd.f32 1.0, %v394_v39 }
 0x117   :  { %397 = vrcp.f32 %v226_v40 }
 0x122   :  { %v396_v41 = vpop.eup %395 }
 0x123   :  { %399 = vlog2.f32 %v396_v41  ;;  %v239_v42 = vsub.f32 0.0, %v396_v41 }
 0x124   :  { %v398_v43 = vpop.eup %397 }
 0x125   :  { %v241_v44 = vadd.f32 1.0, %v239_v42  ;;  %401 = vlog2.f32 %v398_v43  ;;  %v240_v45 = vsub.f32 0.0, %v398_v43  ;;  %v244_v47 = vmul.f32 -0.5, %v239_v42 }
 0x126   :  { %v247_v53 = vand.u32 2147483647, %v239_v42 }
 0x127   :  { %403 = vlog2.f32 %v241_v44  ;;  %v250_v46 = vadd.f32 1.0, %v240_v45  ;;  %v253_v48 = vmul.f32 -0.5, %v240_v45  ;;  %v245_v50 = vadd.f32 1.0, %v244_v47 }
 0x128   :  { %v256_v57 = vand.u32 2147483647, %v240_v45  ;;  %vm248_vm1 = vcmp.lt.f32.partialorder %v247_v53, 0.0004427343 }
 0x129   :  { %405 = vlog2.f32 %v250_v46  ;;  %v254_v54 = vadd.f32 1.0, %v253_v48  ;;  %v246_v60 = vmul.f32 %v245_v50, %v239_v42 }
 0x12a   :  { %vm257_vm2 = vcmp.lt.f32.partialorder %v256_v57, 0.0004427343 }
 0x12b   :  { %v255_v3 = vmul.f32 %v254_v54, %v240_v45 }
 0x130   :  { %v400_v49 = vpop.eup %399 }
 0x131   :  { %v234_v52 = vmul.f32 0.6931472, %v400_v49 }
 0x132   :  { %v402_v51 = vpop.eup %401 }
 0x133   :  { %v236_v56 = vmul.f32 0.6931472, %v402_v51  ;;  %v237_v62 = vmax.f32 %v234_v52, -100.0 }
 0x134   :  { %v404_v55 = vpop.eup %403 }
 0x135   :  { %v243_v59 = vmul.f32 0.6931472, %v404_v55  ;;  %v238_v4 = vmax.f32 %v236_v56, -100.0  ;;  %v261_v9 = vmul.f32 %v237_v62, %v231_v58 }
 0x136   :  { %v406_v61 = vpop.eup %405 }
 0x137   :  { %v249_v1 = vsel %vm248_vm1, %v246_v60, %v243_v59  ;;  %v252_v2 = vmul.f32 0.6931472, %v406_v61  ;;  %v262_v11 = vmul.f32 %v238_v4, %v232_v0 }
 0x138   :  { %v259_v5 = vmax.f32 %v249_v1, -100.0 }
 0x139   :  { %v258_v7 = vsel %vm257_vm2, %v255_v3, %v252_v2 }
 0x13a   :  { %v260_v8 = vmax.f32 %v258_v7, -100.0  ;;  %v265_v10 = vmul.f32 %v263_v63, %v259_v5 }
 0x13c   :  { %v266_v12 = vmul.f32 %v264_v6, %v260_v8  ;;  %v267_v13 = vadd.f32 %v265_v10, %v261_v9 }
 0x13e   :  { %v268_v14 = vadd.f32 %v266_v12, %v262_v11  ;;  %v269_v15 = vsub.f32 0.0, %v267_v13 }
 0x140   :  { %v270_v16 = vsub.f32 0.0, %v268_v14  ;;  %v271_v17 = vrot.slane %v269_v15, 4 }
 0x142   :  { %v272_v18 = vadd.f32 %v271_v17, %v269_v15  ;;  %v277_v19 = vrot.slane %v270_v16, 4 }
 0x144   :  { %v273_v20 = vrot.slane %v272_v18, 2  ;;  %v278_v21 = vadd.f32 %v277_v19, %v270_v16 }
 0x146   :  { %v274_v25 = vadd.f32 %v273_v20, %v272_v18  ;;  %v279_v26 = vrot.slane %v278_v21, 2 }
 0x148   :  { %v275_v27 = vrot.slane %v274_v25, 1  ;;  %v280_v28 = vadd.f32 %v279_v26, %v278_v21 }
 0x14a   :  { %v281_v31 = vrot.slane %v280_v28, 1  ;;  %v276_v32 = vadd.f32 %v275_v27, %v274_v25 }
 0x14c   :  { %v282_v33 = vadd.f32 %v281_v31, %v280_v28 }
 0x14e   :  { %v285_v35 = vcombine.low %v276_v32, %v282_v33 }
 0x150   :  { %v292_v36 = vrot.slane %v285_v35, %v291_v34 }
 0x152   :  { %v299_v37 = vrot.slane %v292_v36, %v291_v34 }
 0x154   :  { %305 = vst.msk [vmem:[#allocation2] sm:$0x3] %vm303_vm3, %v299_v37 }
 0x155   :  { %418 = shalt.err (!%p415_p4)
}
 0x156   :  { %315 = dma.vmem_to_hbm [thread:$0]  %s313_s25, 32, %s596_s3, [#allocation3]  }
 0x157   :  { %427 = dma.done.wait [#allocation3], 32  }
 0x158   :  { %428 = vsyncadd [#allocation3], 4294967264 }
 0x159   :  { %319 = vsyncpa [#allocation3], 1 }

</bundles_post_ra>
